<compile_context>
chip_gen: v7x
topology: tpu7x:2x2x1
jax: 0.10.0
libtpu: 0.0.40
codegen_flags: <defaults>
</compile_context>

<pallas_src>
import jax
import jax.numpy as jnp
from jax.experimental import pallas as pl
from jax.experimental.pallas import tpu as pltpu


_LANE = 128
_VMEM_LIMIT_BYTES = 32 * 1024 * 1024   # fits scoped VMEM on v5e/v6e/v7x
_BLOCK_BUDGET_BYTES = 4 * 1024 * 1024  # per buffer; x2 dbl-buffer x (in+out) = 16 MiB


def _copy_kernel(x_ref, o_ref):
    # The channel permutation is done entirely by the BlockSpec index_maps,
    # so the hot path is a plain lane-dense VMEM copy.
    o_ref[...] = x_ref[...]


def _sublane_pack(dtype) -> int:
    # Sub-32-bit dtypes pack along sublanes: f32 -> 8, bf16 -> 16, int8 -> 32.
    return max(1, 4 // jnp.dtype(dtype).itemsize) * 8


def _pick_channel_block(cpg: int, hw: int, itemsize: int, sublane: int) -> int:
    """Largest channel block <= VMEM budget (divisor of cpg, sublane-aligned)."""
    if cpg * hw * itemsize <= _BLOCK_BUDGET_BYTES:
        return cpg
    for cb in range(cpg - 1, 0, -1):
        if (cpg % cb == 0 and cb % sublane == 0
                and cb * hw * itemsize <= _BLOCK_BUDGET_BYTES):
            return cb
    return cpg  # no aligned divisor fits; rely on vmem_limit_bytes


def _shuffle_fast(x: jax.Array, g: int) -> jax.Array:
    """Group-at-a-time copy: grid (N, g, cpg/cb), big contiguous DMAs."""
    N, C, H, W = x.shape
    cpg = C // g
    hw = H * W
    itemsize = jnp.dtype(x.dtype).itemsize
    cb = _pick_channel_block(cpg, hw, itemsize, _sublane_pack(x.dtype))

    # Free view of contiguous NCHW: row (n*g + i1) holds input channels
    # [i1*cpg, (i1+1)*cpg) of batch n, flattened spatially.
    x_in = x.reshape(N * g, cpg, hw)

    # Output laid out as (N, cpg, g*HW); reshaping it back to (N, C, H, W) at
    # the end reproduces out[n, i2*g + i1] = in[n, i1*cpg + i2].
    out3 = pl.pallas_call(
        _copy_kernel,
        out_shape=jax.ShapeDtypeStruct((N, cpg, g * hw), x.dtype),
        grid_spec=pltpu.PrefetchScalarGridSpec(
            num_scalar_prefetch=0,
            grid=(N, g, cpg // cb),
            in_specs=[
                # Contiguous read of cb channels of input group i1.
                pl.BlockSpec((1, cb, hw), lambda n, i1, j: (n * g + i1, j, 0)),
            ],
            # Lane-dense write: last block dim is hw (multiple of 128).
            out_specs=pl.BlockSpec((1, cb, hw), lambda n, i1, j: (n, j, i1)),
        ),
        compiler_params=pltpu.CompilerParams(
            dimension_semantics=("parallel", "parallel", "parallel"),
            vmem_limit_bytes=_VMEM_LIMIT_BYTES,
        ),
    )(x_in)
    return out3.reshape(N, C, H, W)


def _shuffle_fallback(x: jax.Array, g: int) -> jax.Array:
    """Per-channel copy (channel remap in the input index_map); always legal."""
    N, C, H, W = x.shape
    cpg = C // g
    hw = H * W
    x3 = x.reshape(N, C, hw)  # flatten H*W -> lane-dense last dim

    def in_index_map(n, c):
        # output channel c -> input channel (c % g) * cpg + c // g
        return (n, (c % g) * cpg + c // g, 0)

    out3 = pl.pallas_call(
        _copy_kernel,
        out_shape=jax.ShapeDtypeStruct((N, C, hw), x.dtype),
        grid_spec=pltpu.PrefetchScalarGridSpec(
            num_scalar_prefetch=0,
            grid=(N, C),
            in_specs=[pl.BlockSpec((1, 1, hw), in_index_map)],
            out_specs=pl.BlockSpec((1, 1, hw), lambda n, c: (n, c, 0)),
        ),
        compiler_params=pltpu.CompilerParams(
            dimension_semantics=("parallel", "parallel"),
            vmem_limit_bytes=_VMEM_LIMIT_BYTES,
        ),
    )(x3)
    return out3.reshape(N, C, H, W)


def channel_shuffle(x: jax.Array, groups: int) -> jax.Array:
    """Pallas implementation of ShuffleOp.forward for NCHW input."""
    N, C, H, W = x.shape
    g = int(groups)
    assert C % g == 0, "channels must be divisible by groups"
    if g == 1 or C == g:
        return x  # permutation is the identity
    if (H * W) % _LANE == 0:
        return _shuffle_fast(x, g)
    # TODO(synk): for very large H*W an HBM->HBM make_async_copy variant
    # (memory_space=pl.ANY) would skip the VMEM round-trip entirely.
    return _shuffle_fallback(x, g)


def channel_shuffle_ref(x: jax.Array, groups: int) -> jax.Array:
    """Pure-JAX reference mirroring the PyTorch view/permute/view."""
    N, C, H, W = x.shape
    g = groups
    return (
        x.reshape(N, g, C // g, H, W)
        .transpose(0, 2, 1, 3, 4)
        .reshape(N, C, H, W)
    )


if __name__ == "__main__":
    key = jax.random.PRNGKey(0)

    # Primary check: module-consistent small shape (fast path, H*W = 256).
    N, C, H, W = 2, 4, 16, 16
    groups = 2
    x = jax.random.normal(key, (N, C, H, W), dtype=jnp.float32)
    out = jax.block_until_ready(channel_shuffle(x, groups))
    ref = channel_shuffle_ref(x, groups)
    assert out.shape == (N, C, H, W) and out.dtype == x.dtype
    assert jnp.array_equal(out, ref), "Pallas channel shuffle mismatch (fast path)"

    # Fallback path check: H*W not a multiple of 128.
    k2 = jax.random.PRNGKey(1)
    x2 = jax.random.normal(k2, (2, 6, 6, 6), dtype=jnp.float32)
    out2 = jax.block_until_ready(channel_shuffle(x2, 3))
    assert jnp.array_equal(out2, channel_shuffle_ref(x2, 3)), \
        "Pallas channel shuffle mismatch (fallback path)"

    # bf16 check on the fast path (sublane-packed dtype).
    x3 = jax.random.normal(k2, (2, 8, 16, 16), dtype=jnp.bfloat16)
    out3 = jax.block_until_ready(channel_shuffle(x3, 4))
    assert jnp.array_equal(out3, channel_shuffle_ref(x3, 4)), \
        "Pallas channel shuffle mismatch (bf16)"

    print("KERNEL_OK")
</pallas_src>

<mosaic_0001>
module attributes {stable_mosaic.version = 11 : i64} {
  func.func @_copy_kernel(%arg0: i32, %arg1: i32, %arg2: i32, %arg3: memref<1x2x256xf32, #tpu.memory_space<vmem>>, %arg4: memref<1x2x256xf32, #tpu.memory_space<vmem>>) attributes {dimension_semantics = [#tpu.dimension_semantics<parallel>, #tpu.dimension_semantics<parallel>, #tpu.dimension_semantics<parallel>], iteration_bounds = array<i64: 2, 2, 1>, scalar_prefetch = 0 : i64, scratch_operands = 0 : i64, tpu.core_type = #tpu.core_type<tc>, window_params = [{transform_indices = @transform_0, window_bounds = array<i64: 1, 2, 256>}, {transform_indices = @transform_1, window_bounds = array<i64: 1, 2, 256>}]} {
    %c0 = arith.constant 0 : index
    %c0_0 = arith.constant 0 : index
    %c0_1 = arith.constant 0 : index
    %0 = vector.load %arg3[%c0, %c0_0, %c0_1] : memref<1x2x256xf32, #tpu.memory_space<vmem>>, vector<1x2x256xf32>
    %c0_2 = arith.constant 0 : index
    %c0_3 = arith.constant 0 : index
    %c0_4 = arith.constant 0 : index
    %1 = vector.load %arg4[%c0_2, %c0_3, %c0_4] : memref<1x2x256xf32, #tpu.memory_space<vmem>>, vector<1x2x256xf32>
    tpu.vector_store %arg4[%c0_2, %c0_3, %c0_4], %0 {strides = array<i32>} : memref<1x2x256xf32, #tpu.memory_space<vmem>>, vector<1x2x256xf32>,
    return
  }
  func.func @transform_0(%arg0: i32, %arg1: i32, %arg2: i32) -> (i32, i32, i32) {
    %c2_i32 = arith.constant 2 : i32
    %0 = arith.muli %arg0, %c2_i32 : i32
    %1 = arith.addi %0, %arg1 : i32
    %c0_i32 = arith.constant 0 : i32
    %c0_i32_0 = arith.constant 0 : i32
    return %1, %arg2, %c0_i32 : i32, i32, i32
  }
  func.func @transform_1(%arg0: i32, %arg1: i32, %arg2: i32) -> (i32, i32, i32) {
    %c0_i32 = arith.constant 0 : i32
    return %arg0, %arg2, %arg1 : i32, i32, i32
  }
}

</mosaic_0001>

<bundles_post_ra>
// kernel: tpu_custom_call.1
= control target key start
LH: loop header
LB: loop body
LE: loop exit
PB: predicated region body
PF: predicated region fallthrough
CT: control target
= control target key end

     0   :  { %6 = vsyncpa [#allocation3], 0  ;;  %s803_s0 = inlined_call_operand.hbm [shape: f32[4,2,256], index: 0, kind: input, shape index: {}]   ;;  %s804_s1 = inlined_call_operand.hbm [shape: f32[2,2,512], index: 1, kind: output, shape index: {}]  }
   0x1   :  { %8 = vsyncpa [#allocation3 + $0x1], 0 }
   0x2   :  { %9 = vsyncpa [#allocation4], 0 }
   0x3   :  { %11 = vsyncpa [#allocation4 + $0x1], 0  ;;  %s572_s6 = smov 0   ;;  %s574_s7 = smov 0  }
   0x4   :  { %s576_s8 = smov 0   ;;  %s578_s9 = smov 0  }
   0x5   :  { %s580_s10 = smov 0   ;;  %s582_s11 = smov 0  }
   0x6   :  { %s584_s12 = smov 0   ;;  %s586_s13 = smov 0  }
   0x7   :  { %s588_s14 = smov 0   ;;  %s590_s15 = smov 0  }
   0x8   :  { %s592_s16 = smov 0  }
   0x9 LB: > { %s284_s17 = sadd.s32 4294967295, %s558_s16   ;;  %s285_s18 = sadd.s32 4294967294, %s558_s16   ;;  %s558_s16 = sphi %s592_s16, %s17_s16   ;;  %s554_s15 = sphi %s590_s15, %s824_s15   ;;  %s550_s14 = sphi %s588_s14, %s823_s14   ;;  %s546_s13 = sphi %s586_s13, %s822_s13   ;;  %s542_s12 = sphi %s584_s12, %s821_s12   ;;  %s538_s11 = sphi %s582_s11, %s820_s11   ;;  %s534_s10 = sphi %s580_s10, %s819_s10   ;;  %s530_s9 = sphi %s578_s9, %s818_s9   ;;  %s526_s8 = sphi %s576_s8, %s817_s8   ;;  %s522_s7 = sphi %s574_s7, %s816_s7   ;;  %s518_s6 = sphi %s572_s6, %s815_s6  }
   0xa   : > { %s32_s19 = sadd.s32 1, %s550_s14  ;;  %s36_s20 = sadd.s32 1, %s554_s15 }
   0xb   : > { %p34_p0 = scmp.ge.s32.totalorder %s32_s19, 2  ;;  %s286_s21 = sshll.u32 %s554_s15, 1 }
   0xc   : > { %s631_s22 = sadd.s32 %s550_s14, %s286_s21  ;;  %s49_s23 = sadd.s32 1, %s538_s11 }
   0xd   : > { %s826_s19 = smov (%p34_p0, %s32_s19), 0  ;;  %s828_s20 = smov (!%p34_p0, %s36_s20), %s554_s15 }
   0xe   : > { %p56_p1 = scmp.ne.s32.totalorder %s538_s11, %s534_s10  ;;  %p57_p2 = scmp.eq.s32.totalorder %s558_s16, 0 }
   0xf   : > { %p38_p3 = scmp.ge.s32.totalorder %s828_s20, 2  ;;  %p62_p4 = scmp.ne.s32.totalorder %s534_s10, %s530_s9 }
  0x10   : > { %p641_p5 = por %p57_p2, %p56_p1  ;;  %p63_p6 = scmp.eq.s32.totalorder %s284_s17, 0 }
  0x11   : > { %s830_s20 = smov (%p38_p3, %s828_s20), 0  ;;  %s75_s26 = ssub.s32 %s550_s14, %s826_s19 }
  0x12   : > { %p649_p7 = por %p63_p6, %p62_p4  ;;  %s287_s27 = sshll.u32 %s830_s20, 1 }
  0x13   : > { %s72_s28 = ssub.s32 %s554_s15, %s830_s20  ;;  %s43_s29 = sadd.s32 %s287_s27, %s826_s19 }
  0x14   : > { %s76_s30 = sor.u32 %s75_s26, %s72_s28  ;;  %s44_s2 = ssub.s32 %s631_s22, %s43_s29 }
  0x15   : > { %p77_p8 = scmp.eq.s32.totalorder %s76_s30, 0  ;;  %p47_p9 = scmp.eq.s32.totalorder %s44_s2, 0 }
  0x16   : > { %s79_s3 = sadd.s32 1, %s526_s8  ;;  %p89_p10 = scmp.ne.s32.totalorder %s526_s8, %s522_s7 }
  0x17   : > { %s662_s4 = scalar_select %p77_p8, %s526_s8, %s79_s3  }
  0x18   : > { %s665_s5 = scalar_select %p47_p9, %s538_s11, %s49_s23  }
  0x19   : > { %p90_p11 = scmp.eq.s32.totalorder %s284_s17, 3  ;;  %p95_p12 = scmp.ne.s32.totalorder %s522_s7, %s518_s6 }
  0x1a   : > { %p96_p13 = scmp.eq.s32.totalorder %s285_s18, 3  ;;  %p316_p2 = scmp.lt.s32.totalorder %s558_s16, 4 }
  0x1b   : > { %p675_p0 = por %p90_p11, %p89_p10  ;;  %s116_s26 = sand.u32 1, %s538_s11  }
  0x1c   : > { %p679_p1 = por %p96_p13, %p95_p12  ;;  %s303_s23 = sshll.u32 %s631_s22, 6 }
  0x1d   : > { %s808_s9 = scalar_select %p675_p0, 1, 0 }
  0x1e   : > { %s809_s21 = scalar_select %p679_p1, 1, 0 }
  0x1f   : > { %s290_s27 = sshll.u32 %s116_s26, 2  ;;  %s689_s30 = scalar_lea.hbm %s803_s0, %s303_s23 }
  0x20   : > { %s120_s17 = scalar_lea.vmem [#allocation2], %s290_s27  ;;  %p693_p3 = pnand %p316_p2, %p641_p5 }
  0x21   : > { %s132_s18 = sshll.u32 %s120_s17, 4  ;;  %s117_s22 = scalar_lea.sflag [#allocation3], %s116_s26  ;;  %s697_s18 = int_to_ptr.vmem [resolvable:$true] %s132_s18 }
  0x22   : > { %s406_s3 = scalar_lea.hbm %s689_s30, 64  ;;  %p408_p9 = pneg %p693_p3 }
  0x23   : > { %p407_p8 = scmp.ne.s32.totalorder %s689_s30, %s406_s3  ;;  %s411_s27 = scalar_lea.hbm %s803_s0, 256 }
  0x24   : > { %p412_p5 = scmp.lt.u32.totalorder %s689_s30, %s803_s0  ;;  %p413_p12 = scmp.lt.u32.totalorder %s411_s27, %s406_s3 }
  0x25   : > { %p409_p10 = pnand %p408_p9, %p407_p8  ;;  %p415_p2 = scmp.lt.u32.totalorder %s406_s3, %s689_s30 }
  0x26   : > { %p414_p13 = por %p413_p12, %p412_p5 }
  0x27   : > { %p410_p11 = pneg %p409_p10 }
  0x28   : > { %p416_p4 = por %p415_p2, %p414_p13 }
  0x2a   : > { %p417_p6 = pnand %p416_p4, %p410_p11 }
  0x2c   : > { %420 = shalt.err (!%p417_p6)
}
  0x2d   : > { %s421_s26 = scalar_lea.vmem %s697_s18, 64  ;;  %s560_s17 = smov [#allocation2]  }
  0x2e   : > { %p422_p8 = scmp.ne.s32.totalorder %s697_s18, %s421_s26  ;;  %s426_s24 = sshll.u32 %s560_s17, 4  ;;  %s427_s24 = int_to_ptr.vmem [resolvable:$false] %s426_s24 }
  0x2f   : > { %s428_s23 = scalar_lea.vmem %s427_s24, 128  ;;  %p429_p0 = scmp.lt.s32.totalorder %s697_s18, %s427_s24 }
  0x30   : > { %p424_p10 = pnand %p422_p8, %p408_p9  ;;  %p430_p5 = scmp.lt.s32.totalorder %s428_s23, %s421_s26 }
  0x32   : > { %p425_p1 = pneg %p424_p10  ;;  %p431_p12 = por %p430_p5, %p429_p0 }
  0x34   : > { %p432_p13 = pnand %p431_p12, %p425_p1 }
  0x36   : > { %435 = shalt.err (!%p432_p13)
}
  0x37   : > { %311 = dma.hbm_to_vmem [thread:$0]  (!%p693_p3), %s689_s30, 64, %s697_s18, %s117_s22  }
  0x38   : > { %p811_p4 = scmp.lt.s32.totalorder %s558_s16, 5  ;;  %p812_p6 = scmp.ge.s32.totalorder %s558_s16, 1 }
  0x3a   : > { %p138_p9 = pnand %p812_p6, %p811_p4 }
  0x3b   : > { %s143_s3 = sand.u32 (!%p138_p9), 1, %s534_s10  }
  0x3c   : > { %141 = sbr.rel (%p138_p9) target bundleno = 96 (0x60), region = 24  ;;  %s295_s27 = sshll.u32 (!%p138_p9), %s143_s3, 2 }
  0x3d   : > { %s144_s28 = scalar_lea.sflag (!%p138_p9), [#allocation3], %s143_s3  ;;  %s147_s29 = scalar_lea.vmem (!%p138_p9), [#allocation2], %s295_s27 }
  0x43   : > { %509 = dma.done.wait (%p649_p7), %s144_s28, 64  }
  0x44   : > { %511 = vsyncadd (%p649_p7), %s144_s28, 4294967232  ;;  %s163_s30 = sand.u32 1, %s522_s7   ;;  %s298_s18 = sshll.u32 %s542_s12, 1  ;;  %v169_v0 = vld [vmem:[%s147_s29] sm:$0xf] }
  0x45   : > { %s296_s2 = sshll.u32 %s163_s30, 2  ;;  %s299_s22 = sshll.u32 %s546_s13, 2 }
  0x46   : > { %s165_s26 = scalar_lea.vmem [#allocation5], %s296_s2  ;;  %s186_s24 = sadd.s32 %s299_s22, %s298_s18 }
  0x47   : > { %s190_s17 = sshll.u32 %s165_s26, 4  ;;  %s300_s23 = sshll.u32 %s186_s24, 5  ;;  %170 = vst [vmem:[%s165_s26] sm:$0xf] %v169_v0  ;;  %s738_s17 = int_to_ptr.vmem [resolvable:$true] %s190_s17 }
  0x48   : > { %s743_s25 = scalar_lea.hbm %s804_s1, %s300_s23  ;;  %s172_s28 = scalar_lea.sflag [#allocation4], %s163_s30 }
  0x49   : > { %s436_s12 = scalar_lea.vmem %s738_s17, 64  ;;  %p813_p0 = scmp.ne.s32.totalorder %s808_s9, 0 }
  0x4a   : > { %p437_p7 = scmp.ne.s32.totalorder %s738_s17, %s436_s12  ;;  %s561_s13 = smov [#allocation5]  }
  0x4b   : > { %s440_s18 = sshll.u32 %s561_s13, 4  ;;  %s441_s18 = int_to_ptr.vmem [resolvable:$false] %s440_s18 }
  0x4c   : > { %p438_p1 = pnand %p437_p7, %p813_p0  ;;  %s442_s2 = scalar_lea.vmem %s441_s18, 128 }
  0x4d   : > { %p443_p11 = scmp.lt.s32.totalorder %s738_s17, %s441_s18  ;;  %p444_p2 = scmp.lt.s32.totalorder %s442_s2, %s436_s12 }
  0x4e   : > { %p439_p3 = pneg %p438_p1 }
  0x4f   : > { %p445_p8 = por %p444_p2, %p443_p11 }
  0x51   : > { %p446_p10 = pnand %p445_p8, %p439_p3 }
  0x53   : > { %449 = shalt.err (!%p446_p10)
}
  0x54   : > { %s450_s29 = scalar_lea.hbm %s743_s25, 64  ;;  %s454_s26 = scalar_lea.hbm %s804_s1, 256 }
  0x55   : > { %p451_p5 = scmp.ne.s32.totalorder %s743_s25, %s450_s29  ;;  %p455_p4 = scmp.lt.u32.totalorder %s743_s25, %s804_s1 }
  0x56   : > { %p456_p6 = scmp.lt.u32.totalorder %s454_s26, %s450_s29  ;;  %p458_p7 = scmp.lt.u32.totalorder %s450_s29, %s743_s25 }
  0x57   : > { %p452_p12 = pnand %p451_p5, %p813_p0 }
  0x58   : > { %p457_p9 = por %p456_p6, %p455_p4 }
  0x59   : > { %p453_p13 = pneg %p452_p12 }
  0x5a   : > { %p459_p1 = por %p458_p7, %p457_p9 }
  0x5c   : > { %p460_p3 = pnand %p459_p1, %p453_p13 }
  0x5e   : > { %463 = shalt.err (!%p460_p3)
}
  0x5f   : > { %306 = dma.vmem_to_hbm [thread:$0]  (%p813_p0), %s738_s17, 64, %s743_s25, %s172_s28  }
  0x60 PF: > { %p317_p11 = scmp.ge.s32.totalorder %s558_s16, 2  ;;  %s202_s3 = sand.u32 1, %s518_s6  }
  0x61   : > { %p814_p2 = scmp.ne.s32.totalorder %s809_s21, 0  ;;  %s203_s27 = scalar_lea.sflag [#allocation4], %s202_s3 }
  0x63   : > { %p313_p8 = pnand %p317_p11, %p814_p2 }
  0x65   : > { %513 = dma.done.wait (!%p313_p8), %s203_s27, 64  }
  0x66   : > { %515 = vsyncadd (!%p313_p8), %s203_s27, 4294967232  ;;  %s17_s16 = sadd.s32 1, %s558_s16   ;;  %s815_s6 = smov %s522_s7 }
  0x67   : > { %p14_p10 = scmp.ge.s32.totalorder %s17_s16, 6   ;;  %s816_s7 = smov %s526_s8 }
  0x68   : > { %s817_s8 = smov %s662_s4  ;;  %s818_s9 = smov %s534_s10 }
  0x69   : > { %s819_s10 = smov %s538_s11  ;;  %s820_s11 = smov %s665_s5 }
  0x6a   : > { %s821_s12 = smov %s550_s14  ;;  %s822_s13 = smov %s554_s15 }
  0x6b   : > { %s823_s14 = smov %s826_s19  ;;  %s824_s15 = smov %s830_s20 }
  0x6c   :  { %16 = sbr.rel (!%p14_p10) target bundleno = 9 (0x9), region = 69 }
  0x73   :  { %208 = vsyncpa [#allocation3], 1 }
  0x74   :  { %210 = vsyncpa [#allocation3 + $0x1], 1 }
  0x75   :  { %211 = vsyncpa [#allocation4], 1 }
  0x76   :  { %213 = vsyncpa [#allocation4 + $0x1], 1 }

</bundles_post_ra>
